<compile_context>
chip_gen: v7x
topology: tpu7x:2x2x1
jax: 0.10.0
libtpu: 0.0.40
codegen_flags: <defaults>
</compile_context>

<pallas_src>
import functools

import jax
import jax.numpy as jnp
from jax.experimental import pallas as pl
from jax.experimental.pallas import tpu as pltpu

_OUT_PAD = 128  # pad fc3's 2 outputs to a full lane width for a dense store


def _fcnet_kernel(x_ref, w1_ref, b1_ref, w2_ref, b2_ref, w3_ref, b3_ref, o_ref):
    # fc1: Linear(N, N) + ReLU.  MXU in bf16, f32 accumulation, f32 bias/ReLU.
    x = x_ref[...]
    h1 = jnp.dot(x, w1_ref[...], preferred_element_type=jnp.float32) + b1_ref[...]
    h1 = jnp.maximum(h1, 0.0)
    # fc2: Linear(N, N//2) + ReLU
    h2 = jnp.dot(h1.astype(w2_ref.dtype), w2_ref[...],
                 preferred_element_type=jnp.float32) + b2_ref[...]
    h2 = jnp.maximum(h2, 0.0)
    # fc3: Linear(N//2, 2 padded to 128) + Sigmoid (exp goes to the EUP slot)
    h3 = jnp.dot(h2.astype(w3_ref.dtype), w3_ref[...],
                 preferred_element_type=jnp.float32) + b3_ref[...]
    o_ref[...] = 1.0 / (1.0 + jnp.exp(-h3))


def _round_up(x, m):
    return ((x + m - 1) // m) * m


@functools.partial(jax.jit, static_argnames=("tb",))
def fcnet1_forward(x, params, tb=None):
    """x: (B, N) float32. params: dict of w1,b1,w2,b2,w3,b3 ((in, out) weights)."""
    B, N = x.shape
    n2 = params["w2"].shape[1]

    # Batch tile: feed the MXU M dimension (up to 256 rows), sublane-aligned.
    if tb is None:
        tb = min(256, _round_up(B, 8))
    B_pad = _round_up(B, tb)

    # Cast MXU operands to bf16; biases stay f32.  Pad X rows to B_pad and pad
    # fc3 to 128 output lanes (extra lanes are sliced off at the end).
    bf = jnp.bfloat16
    x_bf = x.astype(bf)
    if B_pad != B:
        x_bf = jnp.pad(x_bf, ((0, B_pad - B), (0, 0)))
    w1 = params["w1"].astype(bf)
    w2 = params["w2"].astype(bf)
    w3 = jnp.pad(params["w3"].astype(bf), ((0, 0), (0, _OUT_PAD - params["w3"].shape[1])))
    b1 = params["b1"].astype(jnp.float32)
    b2 = params["b2"].astype(jnp.float32)
    b3 = jnp.pad(params["b3"].astype(jnp.float32),
                 ((0, 0), (0, _OUT_PAD - params["b3"].shape[1])))

    grid = (B_pad // tb,)
    const2 = lambda i: (0, 0)  # weights/biases: same block every step -> resident
    in_specs = [
        pl.BlockSpec((tb, N), lambda i: (i, 0)),        # X tile (pipelined)
        pl.BlockSpec((N, N), const2),                   # w1
        pl.BlockSpec((1, N), const2),                   # b1
        pl.BlockSpec((N, n2), const2),                  # w2
        pl.BlockSpec((1, n2), const2),                  # b2
        pl.BlockSpec((n2, _OUT_PAD), const2),           # w3 (padded)
        pl.BlockSpec((1, _OUT_PAD), const2),            # b3 (padded)
    ]
    out_spec = pl.BlockSpec((tb, _OUT_PAD), lambda i: (i, 0))

    # Explicit VMEM budget: 2x weight buffers + double-buffered X/out tiles +
    # f32 intermediates, with headroom.  Capped at 64 MiB so it also fits a
    # v7x TensorCore's physical VMEM.
    w_bytes = (N * N + N * n2 + n2 * _OUT_PAD) * 2 + (N + n2 + _OUT_PAD) * 4
    tile_bytes = 2 * (tb * N * 2) + 2 * (tb * _OUT_PAD * 4)
    act_bytes = tb * (N + n2 + _OUT_PAD) * 4
    vmem_limit = int(1.5 * (2 * w_bytes + tile_bytes + act_bytes)) + (4 << 20)
    vmem_limit = max(32 << 20, min(vmem_limit, 64 << 20))

    out = pl.pallas_call(
        _fcnet_kernel,
        out_shape=jax.ShapeDtypeStruct((B_pad, _OUT_PAD), jnp.float32),
        grid=grid,
        in_specs=in_specs,
        out_specs=out_spec,
        compiler_params=pltpu.CompilerParams(
            dimension_semantics=("parallel",),  # v7x: shard batch steps across 2 TCs
            vmem_limit_bytes=vmem_limit,
        ),
    )(x_bf, w1, b1, w2, b2, w3, b3)
    return out[:B, :2]


def init_params(key, N):
    """Deterministic init matching nn.Linear shapes (stored as (in, out))."""
    n2 = N // 2
    ks = jax.random.split(key, 6)

    def u(k, shape, fan_in):
        bound = 1.0 / jnp.sqrt(fan_in)
        return jax.random.uniform(k, shape, jnp.float32, -bound, bound)

    return {
        "w1": u(ks[0], (N, N), N),        # fc1 weight (in, out)
        "b1": u(ks[1], (1, N), N),        # fc1 bias
        "w2": u(ks[2], (N, n2), N),       # fc2 weight
        "b2": u(ks[3], (1, n2), N),       # fc2 bias
        "w3": u(ks[4], (n2, 2), n2),      # fc3 weight
        "b3": u(ks[5], (1, 2), n2),       # fc3 bias
    }


def fcnet1_ref(x, p):
    """Pure-JAX reference with the same bf16-input / f32-accumulate numerics."""
    bf = jnp.bfloat16
    h1 = jnp.maximum(
        jnp.dot(x.astype(bf), p["w1"].astype(bf),
                preferred_element_type=jnp.float32) + p["b1"], 0.0)
    h2 = jnp.maximum(
        jnp.dot(h1.astype(bf), p["w2"].astype(bf),
                preferred_element_type=jnp.float32) + p["b2"], 0.0)
    h3 = jnp.dot(h2.astype(bf), p["w3"].astype(bf),
                 preferred_element_type=jnp.float32) + p["b3"]
    return 1.0 / (1.0 + jnp.exp(-h3))


if __name__ == "__main__":
    B, N = 8, 128  # small batch, lane-aligned feature dim
    key = jax.random.PRNGKey(0)
    kx, kp = jax.random.split(key)
    x = jax.random.normal(kx, (B, N), dtype=jnp.float32)
    params = init_params(kp, N)

    out = jax.block_until_ready(fcnet1_forward(x, params))
    ref = fcnet1_ref(x, params)
    assert out.shape == (B, 2)
    assert jnp.allclose(out, ref, atol=1e-4, rtol=1e-4), "mismatch vs JAX reference"

    # Exercise the multi-step grid + batch-padding path (B not a tile multiple).
    B2 = 200
    x2 = jax.random.normal(kx, (B2, N), dtype=jnp.float32)
    out2 = jax.block_until_ready(fcnet1_forward(x2, params, tb=64))
    ref2 = fcnet1_ref(x2, params)
    assert out2.shape == (B2, 2)
    assert jnp.allclose(out2, ref2, atol=1e-4, rtol=1e-4), "mismatch on tiled path"

    print("KERNEL_OK")
</pallas_src>

<mosaic_0001>
module attributes {stable_mosaic.version = 11 : i64} {
  func.func @_fcnet_kernel(%arg0: i32, %arg1: memref<8x128xbf16, #tpu.memory_space<vmem>>, %arg2: memref<128x128xbf16, #tpu.memory_space<vmem>>, %arg3: memref<1x128xf32, #tpu.memory_space<vmem>>, %arg4: memref<128x64xbf16, #tpu.memory_space<vmem>>, %arg5: memref<1x64xf32, #tpu.memory_space<vmem>>, %arg6: memref<64x128xbf16, #tpu.memory_space<vmem>>, %arg7: memref<1x128xf32, #tpu.memory_space<vmem>>, %arg8: memref<8x128xf32, #tpu.memory_space<vmem>>) attributes {dimension_semantics = [#tpu.dimension_semantics<parallel>], iteration_bounds = array<i64: 1>, scalar_prefetch = 0 : i64, scratch_operands = 0 : i64, tpu.core_type = #tpu.core_type<tc>, window_params = [{transform_indices = @transform_0, window_bounds = array<i64: 8, 128>}, {pipeline_mode = #tpu.pipeline_mode<synchronous>, transform_indices = @transform_1, window_bounds = array<i64: 128, 128>}, {pipeline_mode = #tpu.pipeline_mode<synchronous>, transform_indices = @transform_2, window_bounds = array<i64: 1, 128>}, {pipeline_mode = #tpu.pipeline_mode<synchronous>, transform_indices = @transform_3, window_bounds = array<i64: 128, 64>}, {pipeline_mode = #tpu.pipeline_mode<synchronous>, transform_indices = @transform_4, window_bounds = array<i64: 1, 64>}, {pipeline_mode = #tpu.pipeline_mode<synchronous>, transform_indices = @transform_5, window_bounds = array<i64: 64, 128>}, {pipeline_mode = #tpu.pipeline_mode<synchronous>, transform_indices = @transform_6, window_bounds = array<i64: 1, 128>}, {transform_indices = @transform_7, window_bounds = array<i64: 8, 128>}]} {
    %c0 = arith.constant 0 : index
    %c0_0 = arith.constant 0 : index
    %0 = vector.load %arg1[%c0, %c0_0] : memref<8x128xbf16, #tpu.memory_space<vmem>>, vector<8x128xbf16>
    %c0_1 = arith.constant 0 : index
    %c0_2 = arith.constant 0 : index
    %1 = vector.load %arg2[%c0_1, %c0_2] : memref<128x128xbf16, #tpu.memory_space<vmem>>, vector<128x128xbf16>
    %cst = arith.constant dense<0.000000e+00> : vector<8x128xf32>
    %2 = tpu.matmul %0, %1, %cst {dimension_numbers = #tpu.dot_dimension_numbers<[1], [0], [0], [1], [0, 0, 1, 1], [], []>} : vector<8x128xbf16>, vector<128x128xbf16>, vector<8x128xf32> -> vector<8x128xf32>
    %c0_3 = arith.constant 0 : index
    %c0_4 = arith.constant 0 : index
    %3 = vector.load %arg3[%c0_3, %c0_4] : memref<1x128xf32, #tpu.memory_space<vmem>>, vector<1x128xf32>
    %4 = vector.broadcast %3 : vector<1x128xf32> to vector<8x128xf32>
    %5 = arith.addf %2, %4 : vector<8x128xf32>
    %cst_5 = arith.constant 0.000000e+00 : f32
    %6 = vector.broadcast %cst_5 : f32 to vector<8x128xf32>
    %7 = arith.maximumf %5, %6 : vector<8x128xf32>
    %8 = arith.truncf %7 : vector<8x128xf32> to vector<8x128xbf16>
    %c0_6 = arith.constant 0 : index
    %c0_7 = arith.constant 0 : index
    %9 = vector.load %arg4[%c0_6, %c0_7] : memref<128x64xbf16, #tpu.memory_space<vmem>>, vector<128x64xbf16>
    %cst_8 = arith.constant dense<0.000000e+00> : vector<8x64xf32>
    %10 = tpu.matmul %8, %9, %cst_8 {dimension_numbers = #tpu.dot_dimension_numbers<[1], [0], [0], [1], [0, 0, 1, 1], [], []>} : vector<8x128xbf16>, vector<128x64xbf16>, vector<8x64xf32> -> vector<8x64xf32>
    %c0_9 = arith.constant 0 : index
    %c0_10 = arith.constant 0 : index
    %11 = vector.load %arg5[%c0_9, %c0_10] : memref<1x64xf32, #tpu.memory_space<vmem>>, vector<1x64xf32>
    %12 = vector.broadcast %11 : vector<1x64xf32> to vector<8x64xf32>
    %13 = arith.addf %10, %12 : vector<8x64xf32>
    %cst_11 = arith.constant 0.000000e+00 : f32
    %14 = vector.broadcast %cst_11 : f32 to vector<8x64xf32>
    %15 = arith.maximumf %13, %14 : vector<8x64xf32>
    %16 = arith.truncf %15 : vector<8x64xf32> to vector<8x64xbf16>
    %c0_12 = arith.constant 0 : index
    %c0_13 = arith.constant 0 : index
    %17 = vector.load %arg6[%c0_12, %c0_13] : memref<64x128xbf16, #tpu.memory_space<vmem>>, vector<64x128xbf16>
    %cst_14 = arith.constant dense<0.000000e+00> : vector<8x128xf32>
    %18 = tpu.matmul %16, %17, %cst_14 {dimension_numbers = #tpu.dot_dimension_numbers<[1], [0], [0], [1], [0, 0, 1, 1], [], []>} : vector<8x64xbf16>, vector<64x128xbf16>, vector<8x128xf32> -> vector<8x128xf32>
    %c0_15 = arith.constant 0 : index
    %c0_16 = arith.constant 0 : index
    %19 = vector.load %arg7[%c0_15, %c0_16] : memref<1x128xf32, #tpu.memory_space<vmem>>, vector<1x128xf32>
    %20 = vector.broadcast %19 : vector<1x128xf32> to vector<8x128xf32>
    %21 = arith.addf %18, %20 : vector<8x128xf32>
    %cst_17 = arith.constant 0.000000e+00 : f32
    %22 = vector.broadcast %cst_17 : f32 to vector<8x128xf32>
    %23 = arith.subf %22, %21 : vector<8x128xf32>
    %24 = math.exp %23 : vector<8x128xf32>
    %cst_18 = arith.constant 1.000000e+00 : f32
    %25 = vector.broadcast %cst_18 : f32 to vector<8x128xf32>
    %26 = arith.addf %25, %24 : vector<8x128xf32>
    %cst_19 = arith.constant 1.000000e+00 : f32
    %27 = vector.broadcast %cst_19 : f32 to vector<8x128xf32>
    %28 = arith.divf %27, %26 : vector<8x128xf32>
    %c0_20 = arith.constant 0 : index
    %c0_21 = arith.constant 0 : index
    %29 = vector.load %arg8[%c0_20, %c0_21] : memref<8x128xf32, #tpu.memory_space<vmem>>, vector<8x128xf32>
    tpu.vector_store %arg8[%c0_20, %c0_21], %28 {strides = array<i32>} : memref<8x128xf32, #tpu.memory_space<vmem>>, vector<8x128xf32>,
    return
  }
  func.func @transform_0(%arg0: i32) -> (i32, i32) {
    %c0_i32 = arith.constant 0 : i32
    %c0_i32_0 = arith.constant 0 : i32
    return %arg0, %c0_i32 : i32, i32
  }
  func.func @transform_1(%arg0: i32) -> (i32, i32) {
    %c0_i32 = arith.constant 0 : i32
    %c0_i32_0 = arith.constant 0 : i32
    %c0_i32_1 = arith.constant 0 : i32
    return %c0_i32, %c0_i32_0 : i32, i32
  }
  func.func @transform_2(%arg0: i32) -> (i32, i32) {
    %c0_i32 = arith.constant 0 : i32
    %c0_i32_0 = arith.constant 0 : i32
    %c0_i32_1 = arith.constant 0 : i32
    return %c0_i32, %c0_i32_0 : i32, i32
  }
  func.func @transform_3(%arg0: i32) -> (i32, i32) {
    %c0_i32 = arith.constant 0 : i32
    %c0_i32_0 = arith.constant 0 : i32
    %c0_i32_1 = arith.constant 0 : i32
    return %c0_i32, %c0_i32_0 : i32, i32
  }
  func.func @transform_4(%arg0: i32) -> (i32, i32) {
    %c0_i32 = arith.constant 0 : i32
    %c0_i32_0 = arith.constant 0 : i32
    %c0_i32_1 = arith.constant 0 : i32
    return %c0_i32, %c0_i32_0 : i32, i32
  }
  func.func @transform_5(%arg0: i32) -> (i32, i32) {
    %c0_i32 = arith.constant 0 : i32
    %c0_i32_0 = arith.constant 0 : i32
    %c0_i32_1 = arith.constant 0 : i32
    return %c0_i32, %c0_i32_0 : i32, i32
  }
  func.func @transform_6(%arg0: i32) -> (i32, i32) {
    %c0_i32 = arith.constant 0 : i32
    %c0_i32_0 = arith.constant 0 : i32
    %c0_i32_1 = arith.constant 0 : i32
    return %c0_i32, %c0_i32_0 : i32, i32
  }
  func.func @transform_7(%arg0: i32) -> (i32, i32) {
    %c0_i32 = arith.constant 0 : i32
    %c0_i32_0 = arith.constant 0 : i32
    return %arg0, %c0_i32 : i32, i32
  }
}

</mosaic_0001>

<bundles_post_ra>
// kernel: fcnet1_forward.1
= control target key start
LH: loop header
LB: loop body
LE: loop exit
PB: predicated region body
PF: predicated region fallthrough
CT: control target
= control target key end

     0   :  { %v473_v0 = vmov 0.0   ;;  %vm474_vm0 = vmmov 0   ;;  %vm293_vm1 = vcmask 523264   ;;  %s616_s1 = inlined_call_operand.vmem [shape: bf16[128,128], index: 1, kind: input, shape index: {}]   ;;  %s617_s3 = inlined_call_operand.vmem [shape: bf16[128,64], index: 3, kind: input, shape index: {}]   ;;  %s618_s0 = inlined_call_operand.vmem [shape: bf16[8,128], index: 0, kind: input, shape index: {}]   ;;  %s619_s5 = inlined_call_operand.vmem [shape: bf16[64,128], index: 5, kind: input, shape index: {}]   ;;  %s620_s2 = inlined_call_operand.vmem [shape: f32[1,128], index: 2, kind: input, shape index: {}]   ;;  %s621_s4 = inlined_call_operand.vmem [shape: f32[1,64], index: 4, kind: input, shape index: {}]   ;;  %s622_s6 = inlined_call_operand.vmem [shape: f32[1,128], index: 6, kind: input, shape index: {}]   ;;  %s623_s7 = inlined_call_operand.vmem [shape: f32[8,128], index: 7, kind: output, shape index: {}]  }
   0x1   :  { %395 = vmatprep.subr.bf16.mxu0 %v473_v0  ;;  %v449_v1 = vld [vmem:[%s616_s1] sm:$0xff]   ;;  %411 = vmatprep.mubr.msk.bf16.mxu0 %vm474_vm0, %v473_v0  ;;  %v450_v2 = vld [vmem:[%s616_s1 + $0x8] sm:$0xff]   ;;  %v451_v3 = vld [vmem:[%s616_s1 + $0x10] sm:$0xff]  }
   0x2   :  { %415 = vmatprep.subr.bf16.mxu1 %v473_v0  ;;  %431 = vmatprep.mubr.msk.bf16.mxu1 %vm474_vm0, %v473_v0  ;;  %v457_v4 = vld [vmem:[%s617_s3] sm:$0xff]   ;;  %v452_v5 = vld [vmem:[%s616_s1 + $0x18] sm:$0xff]   ;;  %v458_v6 = vld [vmem:[%s617_s3 + $0x8] sm:$0xff]  }
   0x3   :  { %396 = vmatpush3.bf16.msra.mxu0 %v449_v1  ;;  %416 = vmatpush3.bf16.msra.mxu1 %v457_v4  ;;  %v453_v7 = vld [vmem:[%s616_s1 + $0x20] sm:$0xff]   ;;  %v459_v8 = vld [vmem:[%s617_s3 + $0x10] sm:$0xff]   ;;  %v454_v9 = vld [vmem:[%s616_s1 + $0x28] sm:$0xff]  }
   0x4   :  { %397 = vmatprep.subr.bf16.mxu0 %v473_v0  ;;  %417 = vmatprep.subr.bf16.mxu1 %v473_v0  ;;  %v460_v10 = vld [vmem:[%s617_s3 + $0x18] sm:$0xff]   ;;  %v455_v11 = vld [vmem:[%s616_s1 + $0x30] sm:$0xff]   ;;  %v461_v12 = vld [vmem:[%s617_s3 + $0x20] sm:$0xff]  }
   0x5   :  { %v456_v13 = vld [vmem:[%s616_s1 + $0x38] sm:$0xff]   ;;  %v462_v14 = vld [vmem:[%s617_s3 + $0x28] sm:$0xff]   ;;  %v27_v15 = vld [vmem:[%s618_s0] sm:$0xf] }
   0x6   :  { %v463_v16 = vld [vmem:[%s617_s3 + $0x30] sm:$0xff]   ;;  %v464_v17 = vld [vmem:[%s617_s3 + $0x38] sm:$0xff]   ;;  %v465_v18 = vld [vmem:[%s619_s5] sm:$0xff]  }
   0x7   :  { %398 = vmatpush3.bf16.msra.mxu0 %v450_v2  ;;  %418 = vmatpush3.bf16.msra.mxu1 %v458_v6  ;;  %v466_v19 = vld [vmem:[%s619_s5 + $0x8] sm:$0xff]   ;;  %v348_v20 = vld [vmem:[%s620_s2] ss:$0 sm:$0xff]  ;;  %v467_v28 = vld [vmem:[%s619_s5 + $0x10] sm:$0xff]  }
   0x8   :  { %399 = vmatprep.subr.bf16.mxu0 %v473_v0  ;;  %419 = vmatprep.subr.bf16.mxu1 %v473_v0  ;;  %v468_v29 = vld [vmem:[%s619_s5 + $0x18] sm:$0xff]   ;;  %v357_v30 = vld [vmem:[%s621_s4] ss:$0 sm:$0xff] }
   0x9   :  { %v366_v38 = vld [vmem:[%s622_s6] ss:$0 sm:$0xff] }
   0xb   :  { %400 = vmatpush3.bf16.msra.mxu0 %v451_v3  ;;  %420 = vmatpush3.bf16.msra.mxu1 %v459_v8 }
   0xc   :  { %401 = vmatprep.subr.bf16.mxu0 %v473_v0  ;;  %421 = vmatprep.subr.bf16.mxu1 %v473_v0 }
   0xf   :  { %402 = vmatpush3.bf16.msra.mxu0 %v452_v5  ;;  %422 = vmatpush3.bf16.msra.mxu1 %v460_v10 }
  0x10   :  { %403 = vmatprep.subr.bf16.mxu0 %v473_v0  ;;  %423 = vmatprep.subr.bf16.mxu1 %v473_v0 }
  0x13   :  { %404 = vmatpush3.bf16.msra.mxu0 %v453_v7  ;;  %424 = vmatpush3.bf16.msra.mxu1 %v461_v12 }
  0x14   :  { %405 = vmatprep.subr.bf16.mxu0 %v473_v0  ;;  %425 = vmatprep.subr.bf16.mxu1 %v473_v0 }
  0x17   :  { %406 = vmatpush3.bf16.msra.mxu0 %v454_v9  ;;  %426 = vmatpush3.bf16.msra.mxu1 %v462_v14 }
  0x18   :  { %407 = vmatprep.subr.bf16.mxu0 %v473_v0  ;;  %427 = vmatprep.subr.bf16.mxu1 %v473_v0 }
  0x1b   :  { %408 = vmatpush3.bf16.msra.mxu0 %v455_v11  ;;  %428 = vmatpush3.bf16.msra.mxu1 %v463_v16 }
  0x1c   :  { %409 = vmatprep.subr.bf16.mxu0 %v473_v0  ;;  %429 = vmatprep.subr.bf16.mxu1 %v473_v0 }
  0x1f   :  { %410 = vmatpush3.bf16.msra.mxu0 %v456_v13  ;;  %430 = vmatpush3.bf16.msra.mxu1 %v464_v17 }
  0x20   :  { %435 = vmatprep.subr.bf16.mxu0 %v473_v0 }
  0x22   :  { %412 = vmatmul.mubr.bf16.vlgmr.msra.gmra.mrb[0].mxu0 %v27_v15 }
  0x23   :  { %443 = vmatprep.mubr.msk.bf16.mxu0 %vm474_vm0, %v473_v0  ;;  %436 = vmatpush3.bf16.msra.mxu0 %v465_v18 }
  0x24   :  { %437 = vmatprep.subr.bf16.mxu0 %v473_v0 }
  0x27   :  { %438 = vmatpush3.bf16.msra.mxu0 %v466_v19 }
  0x28   :  { %439 = vmatprep.subr.bf16.mxu0 %v473_v0 }
  0x2b   :  { %440 = vmatpush3.bf16.msra.mxu0 %v467_v28 }
  0x2c   :  { %441 = vmatprep.subr.bf16.mxu0 %v473_v0 }
  0x2f   :  { %442 = vmatpush3.bf16.msra.mxu0 %v468_v29 }
  0xf5   :  { %v133_v21 = vpop.f32.mrb[0].mxu0 }
  0xf6   :  { %v134_v22 = vadd.f32 %v348_v20, %v133_v21  ;;  %v413_v23 = vpop.f32.mrb[1].mxu0 }
  0xf7   :  { %v136_v24 = vpop.f32.mrb[2].mxu0 }
  0xf8   :  { %v139_v25 = vmax.f32 %v134_v22, 0.0  ;;  %v414_v26 = vpop.f32.mrb[3].mxu0 }
  0xfa   :  { %v140_v27 = vpack.c.bf16 %v139_v25, %v139_v25 }
  0xfc   :  { %432 = vmatmul.mubr.bf16.vlgmr.msra.gmra.mrb[0].mxu1 %v140_v27 }
 0x1cf   :  { %v246_v31 = vpop.f32.mrb[0].mxu1 }
 0x1d0   :  { %v247_v32 = vadd.f32 %v357_v30, %v246_v31  ;;  %v433_v33 = vpop.f32.mrb[1].mxu1 }
 0x1d1   :  { %v249_v34 = vpop.f32.mrb[2].mxu1 }
 0x1d2   :  { %v252_v35 = vmax.f32 %v247_v32, 0.0  ;;  %v434_v36 = vpop.f32.mrb[3].mxu1 }
 0x1d4   :  { %v253_v37 = vpack.c.bf16 %v252_v35, %v252_v35 }
 0x1d6   :  { %444 = vmatmul.mubr.msk.bf16.vlgmr.msra.gmra.mrb[4].mxu0 %vm293_vm1, %v253_v37 }
 0x2a9   :  { %v331_v39 = vpop.f32.mrb[4].mxu0 }
 0x2aa   :  { %v332_v40 = vadd.f32 %v366_v38, %v331_v39  ;;  %v445_v41 = vpop.f32.mrb[5].mxu0 }
 0x2ab   :  { %v334_v42 = vpop.f32.mrb[6].mxu0 }
 0x2ac   :  { %v337_v43 = vsub.f32 0.0, %v332_v40  ;;  %v446_v44 = vpop.f32.mrb[7].mxu0 }
 0x2ae   :  { %v338_v45 = vmul.f32 1.442695, %v337_v43 }
 0x2b0   :  { %469 = vpow2.f32 %v338_v45 }
 0x2ba   :  { %v470_v46 = vpop.eup %469 }
 0x2bb   :  { %v340_v47 = vadd.f32 1.0, %v470_v46 }
 0x2bd   :  { %471 = vrcp.f32 %v340_v47 }
 0x2c7   :  { %v472_v48 = vpop.eup %471 }
 0x2c8   :  { %343 = vst [vmem:[%s623_s7] sm:$0xff] %v472_v48 }

</bundles_post_ra>
